<compile_context>
chip_gen: v7x
topology: tpu7x:2x2x1
jax: 0.10.0
libtpu: 0.0.40
codegen_flags: <defaults>
</compile_context>

<pallas_src>
import functools

import jax
import jax.numpy as jnp
from jax.experimental import pallas as pl
from jax.experimental.pallas import tpu as pltpu


def _round_up(x, m):
    return ((x + m - 1) // m) * m


def _supcon_kernel(anchor_ref, contrast_t_ref, a_lab_ref, c_lab_ref, out_ref, *,
                   inv_temperature, loss_scale, block_rows, matmul_dtype):
    """One anchor-row tile of SupConLoss.

    anchor_ref:     [tm, D]  f32            anchor feature rows for this tile
    contrast_t_ref: [D, Nc]  matmul_dtype   full contrast features, transposed
    a_lab_ref:      [tm, 1]  int32          anchor labels for this tile
    c_lab_ref:      [1, Nc]  int32          contrast labels (full)
    out_ref:        [tm, 1]  f32            per-anchor loss for this tile
    """
    pid = pl.program_id(0)

    a = anchor_ref[...]                        # [tm, D] f32
    ct = contrast_t_ref[...]                   # [D, Nc] matmul_dtype
    a_lab = a_lab_ref[...]                     # [tm, 1] int32
    c_lab = c_lab_ref[...]                     # [1, Nc] int32

    # Fold 1/temperature into the small anchor tile (N*D instead of N^2 work),
    # then feed the MXU in matmul_dtype (bf16 by default) with f32 accumulate.
    a_scaled = (a * inv_temperature).astype(matmul_dtype)
    adc = jax.lax.dot_general(
        a_scaled, ct, (((1,), (0,)), ((), ())),
        preferred_element_type=jnp.float32)    # [tm, Nc] f32

    tm, nc = adc.shape

    # Masks built in-kernel — no N x N HBM traffic.
    #   not_diag: 1 everywhere except anchor i vs contrast i (the PyTorch
    #             torch.scatter(ones, 1, arange(Na), 0) logits_mask).
    #   pos:      same label AND not on the diagonal.
    row = pid * block_rows + jax.lax.broadcasted_iota(jnp.int32, (tm, nc), 0)
    col = jax.lax.broadcasted_iota(jnp.int32, (tm, nc), 1)
    not_diag = row != col
    pos_f = jnp.logical_and(a_lab == c_lab, not_diag).astype(jnp.float32)

    # Numerically-stable masked log-softmax over the full contrast axis
    # (each tile sees the entire row, so no online LSE is needed).
    # NOTE: row_max includes the diagonal, exactly like torch.max(adc, dim=1).
    row_max = jnp.max(adc, axis=1, keepdims=True)
    logits = adc - row_max
    exp_logits = jnp.where(not_diag, jnp.exp(logits), 0.0)
    log_denom = jnp.log(jnp.sum(exp_logits, axis=1, keepdims=True) + 1e-30)

    # mean over positives of log_prob, without materializing log_prob:
    #   sum_pos(logits - log_denom) / n_pos == sum_pos(logits)/n_pos - log_denom
    s_pos = jnp.sum(pos_f * logits, axis=1, keepdims=True)
    n_pos = jnp.sum(pos_f, axis=1, keepdims=True)
    # NOTE: matches the PyTorch module exactly — a row with zero positives
    # yields 0/0 (NaN) there as well; we deliberately do not clamp.
    mean_log_prob_pos = s_pos / n_pos - log_denom              # [tm, 1]

    out_ref[...] = loss_scale * mean_log_prob_pos


def _supcon_from_mask_jax(anchor, contrast, mask_bb, anchor_count, contrast_count,
                          temperature, base_temperature):
    """Plain-JAX fallback for an explicit user-provided [B, B] float mask."""
    b = mask_bb.shape[0]
    adc = jnp.matmul(anchor, contrast.T,
                     precision=jax.lax.Precision.HIGHEST) / temperature
    logits = adc - jnp.max(adc, axis=1, keepdims=True)
    mask = jnp.tile(mask_bb.astype(jnp.float32), (anchor_count, contrast_count))
    n_anchor = b * anchor_count
    n_contrast = b * contrast_count
    logits_mask = (jnp.arange(n_anchor)[:, None]
                   != jnp.arange(n_contrast)[None, :]).astype(jnp.float32)
    mask = mask * logits_mask
    exp_logits = jnp.exp(logits) * logits_mask
    log_prob = logits - jnp.log(jnp.sum(exp_logits, axis=1, keepdims=True) + 1e-30)
    mean_log_prob_pos = jnp.sum(mask * log_prob, axis=1) / jnp.sum(mask, axis=1)
    return jnp.mean(-(temperature / base_temperature) * mean_log_prob_pos)


def supcon_loss(features, labels=None, mask=None, *,
                temperature=0.07, contrast_mode='all', base_temperature=0.07,
                matmul_dtype=jnp.bfloat16, block_rows=256):
    """JAX/Pallas equivalent of SupConLoss.forward.

    features: [B, V, D] float; labels: optional [B] int; mask: optional [B, B].
    block_rows: anchor-row tile size (multiple of 8). 256 keeps the per-tile
    working set within v7x's ~32 MiB scoped VMEM for Nc up to a few thousand;
    use 128 on v5e (16 MiB scoped default) for large Nc.
    """
    if labels is not None and mask is not None:
        raise ValueError('Cannot define both `labels` and `mask`')

    batch_size, contrast_count, feat_dim = features.shape

    # torch.cat(torch.unbind(features, dim=1), dim=0): view-major row order.
    contrast_feature = jnp.swapaxes(features, 0, 1).reshape(
        batch_size * contrast_count, feat_dim)

    if contrast_mode == 'one':
        anchor_feature = features[:, 0, :]
        anchor_count = 1
    elif contrast_mode == 'all':
        anchor_feature = contrast_feature
        anchor_count = contrast_count
    else:
        raise ValueError(f'Unknown mode {contrast_mode}')

    if labels is None and mask is None:
        labels_eff = jnp.arange(batch_size, dtype=jnp.int32)   # == eye(B) mask
    elif labels is not None:
        labels_eff = jnp.asarray(labels).reshape(-1).astype(jnp.int32)
        if labels_eff.shape[0] != batch_size:
            raise ValueError('Number of labels does not equal to number of features.')
    else:
        # TODO(synk): route the explicit `mask=` path through the Pallas kernel
        # (needs a tiled mask input instead of the in-kernel label-equality build).
        return _supcon_from_mask_jax(anchor_feature, contrast_feature, mask,
                                     anchor_count, contrast_count,
                                     temperature, base_temperature)

    n_anchor = batch_size * anchor_count
    n_contrast = batch_size * contrast_count

    # Small label vectors instead of N x N masks; one-time transpose of the
    # contrast matrix so every tile does a standard [tm,D] x [D,Nc] contraction.
    a_labels = jnp.tile(labels_eff, anchor_count).reshape(n_anchor, 1)
    c_labels = jnp.tile(labels_eff, contrast_count).reshape(1, n_contrast)
    contrast_t = contrast_feature.T.astype(matmul_dtype)        # [D, Nc]
    anchor_f32 = anchor_feature.astype(jnp.float32)             # [Na, D]

    tm = max(8, min(_round_up(int(block_rows), 8), _round_up(n_anchor, 8)))
    grid = (pl.cdiv(n_anchor, tm),)

    kernel = functools.partial(
        _supcon_kernel,
        inv_temperature=float(1.0 / temperature),
        loss_scale=float(-(temperature / base_temperature)),
        block_rows=tm,
        matmul_dtype=matmul_dtype)

    itemsize_mm = jnp.dtype(matmul_dtype).itemsize
    cost = pl.CostEstimate(
        flops=int(2 * n_anchor * n_contrast * feat_dim            # MXU
                  + 10 * n_anchor * n_contrast),                  # VPU passes
        transcendentals=int(n_anchor * n_contrast + n_anchor),    # exp + log
        bytes_accessed=int(n_anchor * feat_dim * 4                # anchor
                           + n_contrast * feat_dim * itemsize_mm  # contrast^T
                           + (n_anchor + n_contrast) * 4          # labels
                           + n_anchor * 4))                       # output

    per_anchor = pl.pallas_call(
        kernel,
        out_shape=jax.ShapeDtypeStruct((n_anchor, 1), jnp.float32),
        grid_spec=pltpu.PrefetchScalarGridSpec(
            num_scalar_prefetch=0,
            grid=grid,
            in_specs=[
                pl.BlockSpec((tm, feat_dim), lambda i: (i, 0)),          # anchor tile
                pl.BlockSpec((feat_dim, n_contrast), lambda i: (0, 0)),  # contrast^T (resident)
                pl.BlockSpec((tm, 1), lambda i: (i, 0)),                 # anchor labels tile
                pl.BlockSpec((1, n_contrast), lambda i: (0, 0)),         # contrast labels
            ],
            out_specs=pl.BlockSpec((tm, 1), lambda i: (i, 0)),
        ),
        compiler_params=pltpu.CompilerParams(
            dimension_semantics=("parallel",)),
        cost_estimate=cost,
    )(anchor_f32, contrast_t, a_labels, c_labels)

    # loss.view(anchor_count, batch_size).mean() == mean over all Na anchors.
    # (OOB rows of a ragged last tile never land in `per_anchor`, so this is exact.)
    return jnp.sum(per_anchor) / n_anchor


def _supcon_loss_ref(features, labels, *, temperature=0.07, base_temperature=0.07,
                     matmul_dtype=None):
    """Pure-JAX reference mirroring the PyTorch module (contrast_mode='all').

    matmul_dtype=None      -> full f32 matmul (true math).
    matmul_dtype=bfloat16  -> mimic the kernel's bf16 MXU input rounding.
    """
    b, v, d = features.shape
    labels = labels.reshape(-1, 1)
    mask = (labels == labels.T).astype(jnp.float32)
    contrast = jnp.swapaxes(features, 0, 1).reshape(v * b, d)
    anchor = contrast
    if matmul_dtype is None:
        adc = jnp.matmul(anchor, contrast.T,
                         precision=jax.lax.Precision.HIGHEST) / temperature
    else:
        a = (anchor * (1.0 / temperature)).astype(matmul_dtype).astype(jnp.float32)
        c = contrast.astype(matmul_dtype).astype(jnp.float32)
        adc = jnp.matmul(a, c.T, precision=jax.lax.Precision.HIGHEST)
    logits = adc - jnp.max(adc, axis=1, keepdims=True)
    mask = jnp.tile(mask, (v, v))
    n = b * v
    logits_mask = 1.0 - jnp.eye(n, dtype=jnp.float32)
    mask = mask * logits_mask
    exp_logits = jnp.exp(logits) * logits_mask
    log_prob = logits - jnp.log(jnp.sum(exp_logits, axis=1, keepdims=True) + 1e-30)
    mean_log_prob_pos = jnp.sum(mask * log_prob, axis=1) / jnp.sum(mask, axis=1)
    loss = -(temperature / base_temperature) * mean_log_prob_pos
    return jnp.mean(loss)


if __name__ == "__main__":
    key = jax.random.PRNGKey(0)
    k_feat, k_lab = jax.random.split(key)

    batch, n_views, feat_dim = 8, 2, 128     # small, TPU-friendly (D on lanes)
    features = jax.random.normal(k_feat, (batch, n_views, feat_dim), dtype=jnp.float32)
    # L2-normalize like typical SupCon usage.
    features = features / jnp.linalg.norm(features, axis=-1, keepdims=True)
    labels = jax.random.randint(k_lab, (batch,), 0, 3)

    loss = jax.block_until_ready(supcon_loss(features, labels=labels))

    # Tight check against a reference with the same bf16 input rounding,
    # loose check against the exact f32 reference (bf16 MXU approximation).
    ref_bf16 = _supcon_loss_ref(features, labels, matmul_dtype=jnp.bfloat16)
    ref_f32 = _supcon_loss_ref(features, labels)

    if not jnp.allclose(loss, ref_bf16, rtol=2e-3, atol=2e-3):
        raise AssertionError(f"mismatch vs bf16-matched ref: pallas={loss} ref={ref_bf16}")
    if not jnp.allclose(loss, ref_f32, rtol=5e-2, atol=5e-2):
        raise AssertionError(f"mismatch vs f32 ref: pallas={loss} ref={ref_f32}")

    print("KERNEL_OK")
</pallas_src>

<mosaic_0001>
module attributes {stable_mosaic.version = 11 : i64} {
  func.func @_supcon_kernel(%arg0: i32, %arg1: memref<16x128xf32, #tpu.memory_space<vmem>>, %arg2: memref<128x16xbf16, #tpu.memory_space<vmem>>, %arg3: memref<16x1xi32, #tpu.memory_space<vmem>>, %arg4: memref<1x16xi32, #tpu.memory_space<vmem>>, %arg5: memref<16x1xf32, #tpu.memory_space<vmem>>) attributes {dimension_semantics = [#tpu.dimension_semantics<parallel>], iteration_bounds = array<i64: 1>, scalar_prefetch = 0 : i64, scratch_operands = 0 : i64, tpu.core_type = #tpu.core_type<tc>, window_params = [{transform_indices = @transform_0, window_bounds = array<i64: 16, 128>}, {pipeline_mode = #tpu.pipeline_mode<synchronous>, transform_indices = @transform_1, window_bounds = array<i64: 128, 16>}, {transform_indices = @transform_2, window_bounds = array<i64: 16, 1>}, {pipeline_mode = #tpu.pipeline_mode<synchronous>, transform_indices = @transform_3, window_bounds = array<i64: 1, 16>}, {transform_indices = @transform_4, window_bounds = array<i64: 16, 1>}]} {
    %c0 = arith.constant 0 : index
    %c0_0 = arith.constant 0 : index
    %0 = vector.load %arg1[%c0, %c0_0] : memref<16x128xf32, #tpu.memory_space<vmem>>, vector<16x128xf32>
    %c0_1 = arith.constant 0 : index
    %c0_2 = arith.constant 0 : index
    %1 = vector.load %arg2[%c0_1, %c0_2] : memref<128x16xbf16, #tpu.memory_space<vmem>>, vector<128x16xbf16>
    %c0_3 = arith.constant 0 : index
    %c0_4 = arith.constant 0 : index
    %2 = vector.load %arg3[%c0_3, %c0_4] : memref<16x1xi32, #tpu.memory_space<vmem>>, vector<16x1xi32>
    %c0_5 = arith.constant 0 : index
    %c0_6 = arith.constant 0 : index
    %3 = vector.load %arg4[%c0_5, %c0_6] : memref<1x16xi32, #tpu.memory_space<vmem>>, vector<1x16xi32>
    %cst = arith.constant 14.2857141 : f32
    %4 = vector.broadcast %cst : f32 to vector<16x128xf32>
    %5 = arith.mulf %0, %4 : vector<16x128xf32>
    %6 = arith.truncf %5 : vector<16x128xf32> to vector<16x128xbf16>
    %cst_7 = arith.constant dense<0.000000e+00> : vector<16x16xf32>
    %7 = tpu.matmul %6, %1, %cst_7 {dimension_numbers = #tpu.dot_dimension_numbers<[1], [0], [0], [1], [0, 0, 1, 1], [], []>} : vector<16x128xbf16>, vector<128x16xbf16>, vector<16x16xf32> -> vector<16x16xf32>
    %c16_i32 = arith.constant 16 : i32
    %8 = arith.muli %arg0, %c16_i32 : i32
    %9 = tpu.iota {dimensions = array<i32: 0>} : vector<16x16xi32>
    %10 = vector.broadcast %8 : i32 to vector<16x16xi32>
    %11 = arith.addi %10, %9 : vector<16x16xi32>
    %12 = tpu.iota {dimensions = array<i32: 1>} : vector<16x16xi32>
    %13 = arith.cmpi ne, %11, %12 : vector<16x16xi32>
    %14 = vector.broadcast %2 : vector<16x1xi32> to vector<16x16xi32>
    %15 = vector.broadcast %3 : vector<1x16xi32> to vector<16x16xi32>
    %16 = arith.cmpi eq, %14, %15 : vector<16x16xi32>
    %17 = arith.andi %16, %13 : vector<16x16xi1>
    %18 = arith.extui %17 : vector<16x16xi1> to vector<16x16xi32>
    %19 = arith.sitofp %18 : vector<16x16xi32> to vector<16x16xf32>
    %cst_8 = arith.constant dense<0xFF800000> : vector<16xf32>
    %20 = vector.multi_reduction <maximumf>, %7, %cst_8 [1] : vector<16x16xf32> to vector<16xf32>
    %21 = vector.shape_cast %20 : vector<16xf32> to vector<16x1xf32>
    %22 = vector.broadcast %21 : vector<16x1xf32> to vector<16x16xf32>
    %23 = arith.subf %7, %22 : vector<16x16xf32>
    %24 = math.exp %23 : vector<16x16xf32>
    %cst_9 = arith.constant 0.000000e+00 : f32
    %25 = vector.broadcast %cst_9 : f32 to vector<16x16xf32>
    %26 = arith.select %13, %24, %25 : vector<16x16xi1>, vector<16x16xf32>
    %cst_10 = arith.constant dense<0.000000e+00> : vector<16xf32>
    %27 = vector.multi_reduction <add>, %26, %cst_10 [1] : vector<16x16xf32> to vector<16xf32>
    %28 = vector.shape_cast %27 : vector<16xf32> to vector<16x1xf32>
    %cst_11 = arith.constant 1.000000e-30 : f32
    %29 = vector.broadcast %cst_11 : f32 to vector<16x1xf32>
    %30 = arith.addf %28, %29 : vector<16x1xf32>
    %31 = math.log %30 : vector<16x1xf32>
    %32 = arith.mulf %19, %23 : vector<16x16xf32>
    %cst_12 = arith.constant dense<0.000000e+00> : vector<16xf32>
    %33 = vector.multi_reduction <add>, %32, %cst_12 [1] : vector<16x16xf32> to vector<16xf32>
    %34 = vector.shape_cast %33 : vector<16xf32> to vector<16x1xf32>
    %cst_13 = arith.constant dense<0.000000e+00> : vector<16xf32>
    %35 = vector.multi_reduction <add>, %19, %cst_13 [1] : vector<16x16xf32> to vector<16xf32>
    %36 = vector.shape_cast %35 : vector<16xf32> to vector<16x1xf32>
    %37 = arith.divf %34, %36 : vector<16x1xf32>
    %38 = arith.subf %37, %31 : vector<16x1xf32>
    %cst_14 = arith.constant -1.000000e+00 : f32
    %39 = vector.broadcast %cst_14 : f32 to vector<16x1xf32>
    %40 = arith.mulf %39, %38 : vector<16x1xf32>
    %c0_15 = arith.constant 0 : index
    %c0_16 = arith.constant 0 : index
    %41 = vector.load %arg5[%c0_15, %c0_16] : memref<16x1xf32, #tpu.memory_space<vmem>>, vector<16x1xf32>
    tpu.vector_store %arg5[%c0_15, %c0_16], %40 {strides = array<i32>} : memref<16x1xf32, #tpu.memory_space<vmem>>, vector<16x1xf32>,
    return
  }
  func.func @transform_0(%arg0: i32) -> (i32, i32) {
    %c0_i32 = arith.constant 0 : i32
    %c0_i32_0 = arith.constant 0 : i32
    return %arg0, %c0_i32 : i32, i32
  }
  func.func @transform_1(%arg0: i32) -> (i32, i32) {
    %c0_i32 = arith.constant 0 : i32
    %c0_i32_0 = arith.constant 0 : i32
    %c0_i32_1 = arith.constant 0 : i32
    return %c0_i32, %c0_i32_0 : i32, i32
  }
  func.func @transform_2(%arg0: i32) -> (i32, i32) {
    %c0_i32 = arith.constant 0 : i32
    %c0_i32_0 = arith.constant 0 : i32
    return %arg0, %c0_i32 : i32, i32
  }
  func.func @transform_3(%arg0: i32) -> (i32, i32) {
    %c0_i32 = arith.constant 0 : i32
    %c0_i32_0 = arith.constant 0 : i32
    %c0_i32_1 = arith.constant 0 : i32
    return %c0_i32, %c0_i32_0 : i32, i32
  }
  func.func @transform_4(%arg0: i32) -> (i32, i32) {
    %c0_i32 = arith.constant 0 : i32
    %c0_i32_0 = arith.constant 0 : i32
    return %arg0, %c0_i32 : i32, i32
  }
}

</mosaic_0001>

<bundles_post_ra>
// kernel: tpu_custom_call.1
= control target key start
LH: loop header
LB: loop body
LE: loop exit
PB: predicated region body
PF: predicated region fallthrough
CT: control target
= control target key end

     0   :  { %v281_v0 = vmov 0.0   ;;  %vm282_vm0 = vmmov 0   ;;  %v283_v14 = vmov 0   ;;  %vm160_vm1 = vcmask 130048   ;;  %s373_s1 = inlined_call_operand.vmem [shape: bf16[128,16], index: 1, kind: input, shape index: {}]   ;;  %s374_s0 = inlined_call_operand.vmem [shape: f32[16,128], index: 0, kind: input, shape index: {}]   ;;  %s375_s2 = inlined_call_operand.vmem [shape: s32[16,1], index: 2, kind: input, shape index: {}]   ;;  %s376_s3 = inlined_call_operand.vmem [shape: s32[1,16], index: 3, kind: input, shape index: {}]   ;;  %s377_s4 = inlined_call_operand.vmem [shape: f32[16,1], index: 4, kind: output, shape index: {}]  }
   0x1   :  { %236 = vmatprep.subr.bf16.mxu0 %v281_v0  ;;  %v261_v1 = vld [vmem:[%s373_s1] sm:$0xff]   ;;  %252 = vmatprep.mubr.msk.bf16.mxu0 %vm282_vm0, %v281_v0  ;;  %v262_v2 = vld [vmem:[%s373_s1 + $0x8] sm:$0xff]   ;;  %v263_v3 = vld [vmem:[%s373_s1 + $0x10] sm:$0xff]   ;;  %v132_v26 = vlaneseq  ;;  %vm209_vm8 = vcmask 7168  }
   0x2   :  { %237 = vmatpush3.bf16.msra.mxu0 %v261_v1  ;;  %v264_v4 = vld [vmem:[%s373_s1 + $0x18] sm:$0xff]   ;;  %v265_v5 = vld [vmem:[%s373_s1 + $0x20] sm:$0xff]   ;;  %v266_v6 = vld [vmem:[%s373_s1 + $0x28] sm:$0xff]   ;;  %259 = vset.pattern.permute.xlu1 %v283_v14 }
   0x3   :  { %238 = vmatprep.subr.bf16.mxu0 %v281_v0  ;;  %v267_v7 = vld [vmem:[%s373_s1 + $0x30] sm:$0xff]   ;;  %v18_v8 = vld [vmem:[%s374_s0] sm:$0xff]  ;;  %v19_v9 = vld [vmem:[%s374_s0 + $0x8] sm:$0xff]  ;;  %260 = vset.pattern.permute.xlu0 %v283_v14  ;;  %v133_v30 = vshrl.u32 %v132_v26, 7  ;;  %v139_v31 = vand.u32 127, %v132_v26 }
   0x4   :  { %v39_v10 = vmul.f32 14.285714, %v18_v8  ;;  %v40_v11 = vmul.f32 14.285714, %v19_v9  ;;  %v268_v12 = vld [vmem:[%s373_s1 + $0x38] sm:$0xff]   ;;  %v36_v15 = vld [vmem:[%s375_s2] sm:$0xff] }
   0x5   :  { %143 = vperm.xlu1 %259, %v36_v15   ;;  %v37_v16 = vld [vmem:[%s375_s2 + $0x8] sm:$0xff]  ;;  %v224_v32 = vld [vmem:[%s376_s3] ss:$0 sm:$0xff]  ;;  %vm140_vm2 = vcmp.ne.s32.totalorder %v133_v30, %v139_v31  ;;  %v134_v34 = vadd.s32 8, %v133_v30 }
   0x6   :  { %239 = vmatpush3.bf16.msra.mxu0 %v262_v2  ;;  %v41_v13 = vpack.c.bf16 %v40_v11, %v39_v10 }
   0x7   :  { %240 = vmatprep.subr.bf16.mxu0 %v281_v0  ;;  %vm141_vm5 = vcmp.ne.s32.totalorder %v134_v34, %v139_v31 }
   0x9   :  { %146 = vperm.xlu1 %259, %v37_v16  }
   0xa   :  { %241 = vmatpush3.bf16.msra.mxu0 %v263_v3 }
   0xb   :  { %242 = vmatprep.subr.bf16.mxu0 %v281_v0 }
   0xe   :  { %243 = vmatpush3.bf16.msra.mxu0 %v264_v4 }
   0xf   :  { %244 = vmatprep.subr.bf16.mxu0 %v281_v0 }
  0x12   :  { %245 = vmatpush3.bf16.msra.mxu0 %v265_v5 }
  0x13   :  { %246 = vmatprep.subr.bf16.mxu0 %v281_v0 }
  0x16   :  { %247 = vmatpush3.bf16.msra.mxu0 %v266_v6 }
  0x17   :  { %248 = vmatprep.subr.bf16.mxu0 %v281_v0 }
  0x1a   :  { %249 = vmatpush3.bf16.msra.mxu0 %v267_v7 }
  0x1b   :  { %250 = vmatprep.subr.bf16.mxu0 %v281_v0 }
  0x1e   :  { %251 = vmatpush3.bf16.msra.mxu0 %v268_v12 }
  0x21   :  { %253 = vmatmul.mubr.bf16.vlgmr.msra.gmra.mrb[0].mxu0 %v41_v13 }
  0x84   :  { %v144_v33 = vpop.permute.xlu1 %143 }
  0x85   :  { %vm152_vm3 = vcmp.eq.s32.totalorder %v144_v33, %v224_v32 }
  0x86   :  { %vm154_vm4 = vmand %vm152_vm3, %vm140_vm2 }
  0x87   :  { %v225_v39 = vsel %vm154_vm4, 1.0, %v281_v0 }
  0x88   :  { %v147_v36 = vpop.permute.xlu1 %146  ;;  %v195_v41 = vsel %vm160_vm1, %v225_v39, 0.0 }
  0x89   :  { %vm153_vm6 = vcmp.eq.s32.totalorder %v147_v36, %v224_v32 }
  0x8a   :  { %vm155_vm7 = vmand %vm153_vm6, %vm141_vm5 }
  0x8b   :  { %v226_v44 = vsel %vm155_vm7, 1.0, %v281_v0 }
  0x8c   :  { %v198_v45 = vsel %vm160_vm1, %v226_v44, 0.0 }
  0xf4   :  { %v124_v17 = vpop.f32.mrb[0].mxu0 }
  0xf5   :  { %v254_v18 = vpop.f32.mrb[1].mxu0  ;;  %v161_v19 = vsel %vm160_vm1, %v124_v17, -inf }
  0xf6   :  { %162 = vmax.xlane.f32.xlu0 %v161_v19  ;;  %v127_v20 = vpop.f32.mrb[2].mxu0 }
  0xf7   :  { %v255_v21 = vpop.f32.mrb[3].mxu0  ;;  %v164_v22 = vsel %vm160_vm1, %v127_v20, -inf }
  0xfa   :  { %165 = vmax.xlane.f32.xlu0 %v164_v22 }
 0x183   :  { %v163_v23 = vpop.xlane.xlu0 %162 }
 0x184   :  { %v167_v24 = vsub.f32 %v124_v17, %v163_v23 }
 0x186   :  { %v169_v25 = vmul.f32 1.442695, %v167_v24  ;;  %v187_v46 = vmul.f32 %v225_v39, %v167_v24 }
 0x187   :  { %v166_v27 = vpop.xlane.xlu0 %165 }
 0x188   :  { %269 = vpow2.f32 %v169_v25  ;;  %v168_v28 = vsub.f32 %v127_v20, %v166_v27  ;;  %v189_v47 = vsel %vm160_vm1, %v187_v46, 0.0 }
 0x18a   :  { %v171_v29 = vmul.f32 1.442695, %v168_v28  ;;  %v188_v48 = vmul.f32 %v226_v44, %v168_v28 }
 0x18c   :  { %271 = vpow2.f32 %v171_v29  ;;  %v192_v49 = vsel %vm160_vm1, %v188_v48, 0.0 }
 0x192   :  { %v270_v35 = vpop.eup %269 }
 0x193   :  { %v173_v37 = vsel %vm140_vm2, %v270_v35, 0.0 }
 0x194   :  { %v175_v38 = vsel %vm160_vm1, %v173_v37, 0.0 }
 0x195   :  { %176 = vadd.xlane.f32.xlu0 %v175_v38 }
 0x196   :  { %v272_v40 = vpop.eup %271 }
 0x197   :  { %v174_v42 = vsel %vm141_vm5, %v272_v40, 0.0 }
 0x198   :  { %v178_v43 = vsel %vm160_vm1, %v174_v42, 0.0 }
 0x199   :  { %196 = vadd.xlane.f32.xlu0 %v195_v41  ;;  %179 = vadd.xlane.f32.xlu1 %v178_v43 }
 0x19d   :  { %199 = vadd.xlane.f32.xlu0 %v198_v45 }
 0x1a1   :  { %190 = vadd.xlane.f32.xlu0 %v189_v47 }
 0x1a5   :  { %193 = vadd.xlane.f32.xlu0 %v192_v49 }
 0x222   :  { %v177_v50 = vpop.xlane.xlu0 %176 }
 0x223   :  { %v181_v51 = vadd.f32 1e-30, %v177_v50 }
 0x225   :  { %273 = vlog2.f32 %v181_v51 }
 0x226   :  { %v180_v52 = vpop.xlane.xlu1 %179  ;;  %v197_v53 = vpop.xlane.xlu0 %196 }
 0x227   :  { %v182_v54 = vadd.f32 1e-30, %v180_v52  ;;  %275 = vrcp.f32 %v197_v53 }
 0x229   :  { %277 = vlog2.f32 %v182_v54 }
 0x22a   :  { %v200_v55 = vpop.xlane.xlu0 %199 }
 0x22b   :  { %279 = vrcp.f32 %v200_v55 }
 0x22e   :  { %v191_v57 = vpop.xlane.xlu0 %190 }
 0x22f   :  { %v274_v56 = vpop.eup %273 }
 0x230   :  { %v184_v59 = vmul.f32 0.6931472, %v274_v56 }
 0x231   :  { %v276_v58 = vpop.eup %275 }
 0x232   :  { %v202_v60 = vmul.f32 %v276_v58, %v191_v57  ;;  %v194_v0 = vpop.xlane.xlu0 %193 }
 0x233   :  { %v278_v61 = vpop.eup %277 }
 0x234   :  { %v205_v62 = vsub.f32 %v202_v60, %v184_v59  ;;  %v186_v1 = vmul.f32 0.6931472, %v278_v61 }
 0x235   :  { %v280_v63 = vpop.eup %279 }
 0x236   :  { %v207_v2 = vmul.f32 -1.0, %v205_v62  ;;  %v204_v3 = vmul.f32 %v280_v63, %v194_v0 }
 0x238   :  { %210 = vst.msk [vmem:[%s377_s4] sm:$0xff] %vm209_vm8, %v207_v2  ;;  %v206_v4 = vsub.f32 %v204_v3, %v186_v1 }
 0x23a   :  { %v208_v5 = vmul.f32 -1.0, %v206_v4 }
 0x23c   :  { %211 = vst.msk [vmem:[%s377_s4 + $0x8] sm:$0xff] %vm209_vm8, %v208_v5 }

</bundles_post_ra>
